<compile_context>
chip_gen: v7x
topology: tpu7x:2x2x1
jax: 0.10.0
libtpu: 0.0.40
codegen_flags: <defaults>
</compile_context>

<pallas_src>
import functools

import jax
import jax.numpy as jnp
from jax.experimental import pallas as pl
from jax.experimental.pallas import tpu as pltpu

_LANES = 128           # TPU lane width; box index maps to lanes
_MAX_TILE_ROWS = 1024  # sublane rows per grid step -> 1024*128 = 131072 boxes


def _round_up(x, m):
    return ((x + m - 1) // m) * m


def _diou_kernel(p_ref, t_ref, out_ref, *, eps):
    # p_ref / t_ref: (4, TR, 128) f32 slabs (x1, y1, x2, y2); out_ref: (TR, 128)
    # Per-slab reads (no whole-block materialization) keep vreg/VMEM pressure
    # low at large tiles.
    b1_x1 = p_ref[0]
    b1_y1 = p_ref[1]
    b1_x2 = p_ref[2]
    b1_y2 = p_ref[3]
    b2_x1 = t_ref[0]
    b2_y1 = t_ref[1]
    b2_x2 = t_ref[2]
    b2_y2 = t_ref[3]

    # Intersection.
    w = jnp.maximum(jnp.minimum(b1_x2, b2_x2) - jnp.maximum(b1_x1, b2_x1), 0.0)
    h = jnp.maximum(jnp.minimum(b1_y2, b2_y2) - jnp.maximum(b1_y1, b2_y1), 0.0)
    overlap = w * h

    # Union.
    ap = (b1_x2 - b1_x1) * (b1_y2 - b1_y1)
    ag = (b2_x2 - b2_x1) * (b2_y2 - b2_y1)
    union = ap + ag - overlap + eps

    # Smallest enclosing box diagonal^2 (clamp kept to match reference exactly).
    cw = jnp.maximum(jnp.maximum(b1_x2, b2_x2) - jnp.minimum(b1_x1, b2_x1), 0.0)
    ch = jnp.maximum(jnp.maximum(b1_y2, b2_y2) - jnp.minimum(b1_y1, b2_y1), 0.0)
    c2 = cw * cw + ch * ch + eps

    # Center distance^2: rho2 = ((dcx)^2 + (dcy)^2) / 4.
    ddx = (b2_x1 + b2_x2) - (b1_x1 + b1_x2)
    ddy = (b2_y1 + b2_y2) - (b1_y1 + b1_y2)
    rho2 = 0.25 * (ddx * ddx + ddy * ddy)

    # dious = overlap/union - rho2/c2, fused into a single reciprocal.
    dious = (overlap * c2 - rho2 * union) * pl.reciprocal(union * c2,
                                                          approx=False)
    out_ref[...] = 1.0 - dious


def _to_soa_slabs(x, n, n_pad, rows_pad):
    # (N, 4) -> (4, rows_pad, 128): one transpose + one pad (XLA fuses these
    # into a single copy pass), no concat, no scatter-into-zeros.
    x = x.astype(jnp.float32).T                      # (4, N)
    x = jnp.pad(x, ((0, 0), (0, n_pad - n)))          # (4, n_pad)
    return x.reshape(4, rows_pad, _LANES)
    # TODO(synk): ideally the producer would emit coords-major (4, N) boxes so
    # this transpose/pad pre-pass disappears entirely.


def diou_loss_pallas(pred, target, eps=1e-7):
    """pred, target: (N, 4) boxes (x1, y1, x2, y2) -> loss (N,) float32."""
    assert pred.shape == target.shape and pred.shape[-1] == 4
    n = pred.shape[0]

    rows = -(-n // _LANES)                           # ceil(n / 128)
    # Cap block size for VMEM, but also target >=4 grid steps so both v7x
    # TensorCores get work for mid-sized N.
    tile_rows = min(_MAX_TILE_ROWS, _round_up(-(-rows // 4), 8))
    tile_rows = max(tile_rows, 8)
    rows_pad = _round_up(rows, tile_rows)
    n_pad = rows_pad * _LANES

    p = _to_soa_slabs(pred, n, n_pad, rows_pad)
    t = _to_soa_slabs(target, n, n_pad, rows_pad)

    grid = (rows_pad // tile_rows,)
    out = pl.pallas_call(
        functools.partial(_diou_kernel, eps=float(eps)),
        out_shape=jax.ShapeDtypeStruct((rows_pad, _LANES), jnp.float32),
        grid_spec=pltpu.PrefetchScalarGridSpec(
            num_scalar_prefetch=0,
            grid=grid,
            in_specs=[
                pl.BlockSpec((4, tile_rows, _LANES), lambda i: (0, i, 0)),
                pl.BlockSpec((4, tile_rows, _LANES), lambda i: (0, i, 0)),
            ],
            out_specs=pl.BlockSpec((tile_rows, _LANES), lambda i: (i, 0)),
        ),
        compiler_params=pltpu.CompilerParams(
            dimension_semantics=("parallel",)),
    )(p, t)

    return out.reshape(n_pad)[:n]


def _diou_loss_ref(pred, target, eps=1e-7):
    # Pure-JAX reference mirroring the PyTorch code.
    lt = jnp.maximum(pred[:, :2], target[:, :2])
    rb = jnp.minimum(pred[:, 2:], target[:, 2:])
    wh = jnp.maximum(rb - lt, 0.0)
    overlap = wh[:, 0] * wh[:, 1]
    ap = (pred[:, 2] - pred[:, 0]) * (pred[:, 3] - pred[:, 1])
    ag = (target[:, 2] - target[:, 0]) * (target[:, 3] - target[:, 1])
    union = ap + ag - overlap + eps
    ious = overlap / union
    enc_lt = jnp.minimum(pred[:, :2], target[:, :2])
    enc_rb = jnp.maximum(pred[:, 2:], target[:, 2:])
    enc_wh = jnp.maximum(enc_rb - enc_lt, 0.0)
    c2 = enc_wh[:, 0] ** 2 + enc_wh[:, 1] ** 2 + eps
    left = (target[:, 0] + target[:, 2] - (pred[:, 0] + pred[:, 2])) ** 2 / 4
    right = (target[:, 1] + target[:, 3] - (pred[:, 1] + pred[:, 3])) ** 2 / 4
    rho2 = left + right
    return 1 - (ious - rho2 / c2)


if __name__ == "__main__":
    key = jax.random.PRNGKey(0)
    k1, k2 = jax.random.split(key)
    n = 8  # number of boxes

    # Build valid (x1, y1, x2, y2) boxes: x2 >= x1, y2 >= y1.
    xy1_p = jax.random.uniform(k1, (n, 2), jnp.float32, 0.0, 5.0)
    wh_p = jax.random.uniform(k1, (n, 2), jnp.float32, 0.5, 4.0)
    pred = jnp.concatenate([xy1_p, xy1_p + wh_p], axis=1)

    xy1_t = jax.random.uniform(k2, (n, 2), jnp.float32, 0.0, 5.0)
    wh_t = jax.random.uniform(k2, (n, 2), jnp.float32, 0.5, 4.0)
    target = jnp.concatenate([xy1_t, xy1_t + wh_t], axis=1)

    loss = diou_loss_pallas(pred, target)
    jax.block_until_ready(loss)

    ref = _diou_loss_ref(pred, target)
    assert loss.shape == (n,)
    assert jnp.allclose(loss, ref, atol=1e-5, rtol=1e-5), (loss, ref)
    print("KERNEL_OK")
</pallas_src>

<mosaic_0001>
module attributes {stable_mosaic.version = 11 : i64} {
  func.func @_diou_kernel(%arg0: i32, %arg1: memref<4x8x128xf32, #tpu.memory_space<vmem>>, %arg2: memref<4x8x128xf32, #tpu.memory_space<vmem>>, %arg3: memref<8x128xf32, #tpu.memory_space<vmem>>) attributes {dimension_semantics = [#tpu.dimension_semantics<parallel>], iteration_bounds = array<i64: 1>, scalar_prefetch = 0 : i64, scratch_operands = 0 : i64, tpu.core_type = #tpu.core_type<tc>, window_params = [{transform_indices = @transform_0, window_bounds = array<i64: 4, 8, 128>}, {transform_indices = @transform_1, window_bounds = array<i64: 4, 8, 128>}, {transform_indices = @transform_2, window_bounds = array<i64: 8, 128>}]} {
    %c0 = arith.constant 0 : index
    %c0_0 = arith.constant 0 : index
    %c0_1 = arith.constant 0 : index
    %0 = vector.load %arg1[%c0, %c0_0, %c0_1] : memref<4x8x128xf32, #tpu.memory_space<vmem>>, vector<1x8x128xf32>
    %1 = vector.shape_cast %0 : vector<1x8x128xf32> to vector<8x128xf32>
    %c1 = arith.constant 1 : index
    %c0_2 = arith.constant 0 : index
    %c0_3 = arith.constant 0 : index
    %2 = vector.load %arg1[%c1, %c0_2, %c0_3] : memref<4x8x128xf32, #tpu.memory_space<vmem>>, vector<1x8x128xf32>
    %3 = vector.shape_cast %2 : vector<1x8x128xf32> to vector<8x128xf32>
    %c2 = arith.constant 2 : index
    %c0_4 = arith.constant 0 : index
    %c0_5 = arith.constant 0 : index
    %4 = vector.load %arg1[%c2, %c0_4, %c0_5] : memref<4x8x128xf32, #tpu.memory_space<vmem>>, vector<1x8x128xf32>
    %5 = vector.shape_cast %4 : vector<1x8x128xf32> to vector<8x128xf32>
    %c3 = arith.constant 3 : index
    %c0_6 = arith.constant 0 : index
    %c0_7 = arith.constant 0 : index
    %6 = vector.load %arg1[%c3, %c0_6, %c0_7] : memref<4x8x128xf32, #tpu.memory_space<vmem>>, vector<1x8x128xf32>
    %7 = vector.shape_cast %6 : vector<1x8x128xf32> to vector<8x128xf32>
    %c0_8 = arith.constant 0 : index
    %c0_9 = arith.constant 0 : index
    %c0_10 = arith.constant 0 : index
    %8 = vector.load %arg2[%c0_8, %c0_9, %c0_10] : memref<4x8x128xf32, #tpu.memory_space<vmem>>, vector<1x8x128xf32>
    %9 = vector.shape_cast %8 : vector<1x8x128xf32> to vector<8x128xf32>
    %c1_11 = arith.constant 1 : index
    %c0_12 = arith.constant 0 : index
    %c0_13 = arith.constant 0 : index
    %10 = vector.load %arg2[%c1_11, %c0_12, %c0_13] : memref<4x8x128xf32, #tpu.memory_space<vmem>>, vector<1x8x128xf32>
    %11 = vector.shape_cast %10 : vector<1x8x128xf32> to vector<8x128xf32>
    %c2_14 = arith.constant 2 : index
    %c0_15 = arith.constant 0 : index
    %c0_16 = arith.constant 0 : index
    %12 = vector.load %arg2[%c2_14, %c0_15, %c0_16] : memref<4x8x128xf32, #tpu.memory_space<vmem>>, vector<1x8x128xf32>
    %13 = vector.shape_cast %12 : vector<1x8x128xf32> to vector<8x128xf32>
    %c3_17 = arith.constant 3 : index
    %c0_18 = arith.constant 0 : index
    %c0_19 = arith.constant 0 : index
    %14 = vector.load %arg2[%c3_17, %c0_18, %c0_19] : memref<4x8x128xf32, #tpu.memory_space<vmem>>, vector<1x8x128xf32>
    %15 = vector.shape_cast %14 : vector<1x8x128xf32> to vector<8x128xf32>
    %16 = arith.minimumf %5, %13 : vector<8x128xf32>
    %17 = arith.maximumf %1, %9 : vector<8x128xf32>
    %18 = arith.subf %16, %17 : vector<8x128xf32>
    %cst = arith.constant 0.000000e+00 : f32
    %19 = vector.broadcast %cst : f32 to vector<8x128xf32>
    %20 = arith.maximumf %18, %19 : vector<8x128xf32>
    %21 = arith.minimumf %7, %15 : vector<8x128xf32>
    %22 = arith.maximumf %3, %11 : vector<8x128xf32>
    %23 = arith.subf %21, %22 : vector<8x128xf32>
    %cst_20 = arith.constant 0.000000e+00 : f32
    %24 = vector.broadcast %cst_20 : f32 to vector<8x128xf32>
    %25 = arith.maximumf %23, %24 : vector<8x128xf32>
    %26 = arith.mulf %20, %25 : vector<8x128xf32>
    %27 = arith.subf %5, %1 : vector<8x128xf32>
    %28 = arith.subf %7, %3 : vector<8x128xf32>
    %29 = arith.mulf %27, %28 : vector<8x128xf32>
    %30 = arith.subf %13, %9 : vector<8x128xf32>
    %31 = arith.subf %15, %11 : vector<8x128xf32>
    %32 = arith.mulf %30, %31 : vector<8x128xf32>
    %33 = arith.addf %29, %32 : vector<8x128xf32>
    %34 = arith.subf %33, %26 : vector<8x128xf32>
    %cst_21 = arith.constant 1.000000e-07 : f32
    %35 = vector.broadcast %cst_21 : f32 to vector<8x128xf32>
    %36 = arith.addf %34, %35 : vector<8x128xf32>
    %37 = arith.maximumf %5, %13 : vector<8x128xf32>
    %38 = arith.minimumf %1, %9 : vector<8x128xf32>
    %39 = arith.subf %37, %38 : vector<8x128xf32>
    %cst_22 = arith.constant 0.000000e+00 : f32
    %40 = vector.broadcast %cst_22 : f32 to vector<8x128xf32>
    %41 = arith.maximumf %39, %40 : vector<8x128xf32>
    %42 = arith.maximumf %7, %15 : vector<8x128xf32>
    %43 = arith.minimumf %3, %11 : vector<8x128xf32>
    %44 = arith.subf %42, %43 : vector<8x128xf32>
    %cst_23 = arith.constant 0.000000e+00 : f32
    %45 = vector.broadcast %cst_23 : f32 to vector<8x128xf32>
    %46 = arith.maximumf %44, %45 : vector<8x128xf32>
    %47 = arith.mulf %41, %41 : vector<8x128xf32>
    %48 = arith.mulf %46, %46 : vector<8x128xf32>
    %49 = arith.addf %47, %48 : vector<8x128xf32>
    %cst_24 = arith.constant 1.000000e-07 : f32
    %50 = vector.broadcast %cst_24 : f32 to vector<8x128xf32>
    %51 = arith.addf %49, %50 : vector<8x128xf32>
    %52 = arith.addf %9, %13 : vector<8x128xf32>
    %53 = arith.addf %1, %5 : vector<8x128xf32>
    %54 = arith.subf %52, %53 : vector<8x128xf32>
    %55 = arith.addf %11, %15 : vector<8x128xf32>
    %56 = arith.addf %3, %7 : vector<8x128xf32>
    %57 = arith.subf %55, %56 : vector<8x128xf32>
    %58 = arith.mulf %54, %54 : vector<8x128xf32>
    %59 = arith.mulf %57, %57 : vector<8x128xf32>
    %60 = arith.addf %58, %59 : vector<8x128xf32>
    %cst_25 = arith.constant 2.500000e-01 : f32
    %61 = vector.broadcast %cst_25 : f32 to vector<8x128xf32>
    %62 = arith.mulf %61, %60 : vector<8x128xf32>
    %63 = arith.mulf %26, %51 : vector<8x128xf32>
    %64 = arith.mulf %62, %36 : vector<8x128xf32>
    %65 = arith.subf %63, %64 : vector<8x128xf32>
    %66 = arith.mulf %36, %51 : vector<8x128xf32>
    %67 = tpu.reciprocal %66 : vector<8x128xf32> -> vector<8x128xf32>
    %68 = arith.mulf %65, %67 : vector<8x128xf32>
    %cst_26 = arith.constant 1.000000e+00 : f32
    %69 = vector.broadcast %cst_26 : f32 to vector<8x128xf32>
    %70 = arith.subf %69, %68 : vector<8x128xf32>
    %c0_27 = arith.constant 0 : index
    %c0_28 = arith.constant 0 : index
    %71 = vector.load %arg3[%c0_27, %c0_28] : memref<8x128xf32, #tpu.memory_space<vmem>>, vector<8x128xf32>
    tpu.vector_store %arg3[%c0_27, %c0_28], %70 {strides = array<i32>} : memref<8x128xf32, #tpu.memory_space<vmem>>, vector<8x128xf32>,
    return
  }
  func.func @transform_0(%arg0: i32) -> (i32, i32, i32) {
    %c0_i32 = arith.constant 0 : i32
    %c0_i32_0 = arith.constant 0 : i32
    %c0_i32_1 = arith.constant 0 : i32
    return %c0_i32, %arg0, %c0_i32_0 : i32, i32, i32
  }
  func.func @transform_1(%arg0: i32) -> (i32, i32, i32) {
    %c0_i32 = arith.constant 0 : i32
    %c0_i32_0 = arith.constant 0 : i32
    %c0_i32_1 = arith.constant 0 : i32
    return %c0_i32, %arg0, %c0_i32_0 : i32, i32, i32
  }
  func.func @transform_2(%arg0: i32) -> (i32, i32) {
    %c0_i32 = arith.constant 0 : i32
    %c0_i32_0 = arith.constant 0 : i32
    return %arg0, %c0_i32 : i32, i32
  }
}

</mosaic_0001>

<bundles_post_ra>
// kernel: tpu_custom_call.1
= control target key start
LH: loop header
LB: loop body
LE: loop exit
PB: predicated region body
PF: predicated region fallthrough
CT: control target
= control target key end

     0   :  { %7 = vsyncpa [#allocation3], 0  ;;  %s253_s0 = inlined_call_operand.hbm [shape: f32[4,8,128], index: 0, kind: input, shape index: {}]   ;;  %s254_s1 = inlined_call_operand.hbm [shape: f32[4,8,128], index: 1, kind: input, shape index: {}]   ;;  %s255_s2 = inlined_call_operand.hbm [shape: f32[8,128], index: 2, kind: output, shape index: {}]  }
   0x1   :  { %8 = vsyncpa [#allocation6], 0 }
   0x2   :  { %9 = vsyncpa [#allocation4], 0  ;;  %s197_s9 = smov [#allocation2]   ;;  %s125_s13 = scalar_lea.hbm %s253_s0, 512 }
   0x3   :  { %s15_s10 = sshll.u32 %s197_s9, 4  ;;  %p126_p0 = scmp.ne.s32.totalorder %s253_s0, %s125_s13  ;;  %s16_s10 = int_to_ptr.vmem [resolvable:$true] %s15_s10 }
   0x4   :  { %p129_p1 = scmp.lt.u32.totalorder %s125_s13, %s253_s0 }
   0x6   :  { %p131_p2 = pnand %p129_p1, %p126_p0 }
   0x8   :  { %134 = shalt.err (!%p131_p2)
}
   0x9   :  { %s135_s18 = scalar_lea.vmem %s16_s10, 512  ;;  %p140_p4 = scmp.lt.s32.totalorder %s16_s10, %s16_s10 }
   0xa   :  { %p136_p3 = scmp.ne.s32.totalorder %s16_s10, %s135_s18  ;;  %p141_p5 = scmp.lt.s32.totalorder %s135_s18, %s135_s18 }
   0xc   :  { %p142_p6 = por %p141_p5, %p140_p4 }
   0xe   :  { %p143_p7 = pnand %p142_p6, %p136_p3 }
  0x10   :  { %146 = shalt.err (!%p143_p7)
}
  0x11   :  { %s198_s19 = smov 128   ;;  %s199_s20 = smov 8  }
  0x12   :  { %21 = dma.hbm_to_vmem [thread:$0]  %s253_s0, 512, %s16_s10, [#allocation3], %s198_s19, %s198_s19, %s199_s20  }
  0x13   :  { %s200_s23 = smov [#allocation5]   ;;  %s147_s27 = scalar_lea.hbm %s254_s1, 512 }
  0x14   :  { %s27_s24 = sshll.u32 %s200_s23, 4  ;;  %p148_p8 = scmp.ne.s32.totalorder %s254_s1, %s147_s27  ;;  %s28_s24 = int_to_ptr.vmem [resolvable:$true] %s27_s24 }
  0x15   :  { %p151_p9 = scmp.lt.u32.totalorder %s147_s27, %s254_s1 }
  0x17   :  { %p153_p10 = pnand %p151_p9, %p148_p8 }
  0x19   :  { %156 = shalt.err (!%p153_p10)
}
  0x1a   :  { %s157_s4 = scalar_lea.vmem %s28_s24, 512  ;;  %p162_p12 = scmp.lt.s32.totalorder %s28_s24, %s28_s24 }
  0x1b   :  { %p158_p11 = scmp.ne.s32.totalorder %s28_s24, %s157_s4  ;;  %p163_p13 = scmp.lt.s32.totalorder %s157_s4, %s157_s4 }
  0x1d   :  { %p164_p0 = por %p163_p13, %p162_p12 }
  0x1f   :  { %p165_p1 = pnand %p164_p0, %p158_p11 }
  0x21   :  { %168 = shalt.err (!%p165_p1)
}
  0x22   :  { %33 = dma.hbm_to_vmem [thread:$0]  %s254_s1, 512, %s28_s24, [#allocation6], %s198_s19, %s198_s19, %s199_s20  }
  0x23   :  { %191 = dma.done.wait [#allocation3], 512  }
  0x24   :  { %192 = vsyncadd [#allocation3], 4294966784 }
  0x25   :  { %193 = dma.done.wait [#allocation6], 512  }
  0x26   :  { %194 = vsyncadd [#allocation6], 4294966784  ;;  %v40_v0 = vld [vmem:[#allocation2] sm:$0xff]  ;;  %v42_v1 = vld [vmem:[#allocation2 + $0x8] sm:$0xff]  ;;  %s201_s1 = smov [#allocation7]  }
  0x27   :  { %v44_v2 = vld [vmem:[#allocation2 + $0x10] sm:$0xff]  ;;  %v46_v3 = vld [vmem:[#allocation2 + $0x18] sm:$0xff]  ;;  %v47_v4 = vld [vmem:[#allocation5] sm:$0xff]  ;;  %s108_s6 = sshll.u32 %s201_s1, 4  ;;  %s109_s6 = int_to_ptr.vmem [resolvable:$true] %s108_s6 }
  0x28   :  { %v49_v5 = vld [vmem:[#allocation5 + $0x8] sm:$0xff]  ;;  %v63_v6 = vsub.f32 %v44_v2, %v40_v0  ;;  %v85_v7 = vadd.f32 %v44_v2, %v40_v0  ;;  %v51_v8 = vld [vmem:[#allocation5 + $0x10] sm:$0xff]  ;;  %v53_v9 = vld [vmem:[#allocation5 + $0x18] sm:$0xff]  ;;  %v55_v10 = vmax.f32 %v40_v0, %v47_v4  ;;  %v64_v12 = vsub.f32 %v46_v3, %v42_v1  ;;  %s169_s7 = scalar_lea.vmem %s109_s6, 128  ;;  %p174_p3 = scmp.lt.s32.totalorder %s109_s6, %s109_s6 }
  0x29   :  { %v59_v11 = vmax.f32 %v42_v1, %v49_v5  ;;  %v73_v13 = vmin.f32 %v40_v0, %v47_v4  ;;  %v54_v14 = vmin.f32 %v44_v2, %v51_v8  ;;  %v58_v15 = vmin.f32 %v46_v3, %v53_v9  ;;  %p170_p2 = scmp.ne.s32.totalorder %s109_s6, %s169_s7  ;;  %p175_p4 = scmp.lt.s32.totalorder %s169_s7, %s169_s7 }
  0x2a   :  { %v66_v16 = vsub.f32 %v51_v8, %v47_v4  ;;  %v67_v17 = vsub.f32 %v53_v9, %v49_v5  ;;  %v65_v18 = vmul.f32 %v64_v12, %v63_v6  ;;  %v72_v19 = vmax.f32 %v44_v2, %v51_v8 }
  0x2b   :  { %v76_v20 = vmax.f32 %v46_v3, %v53_v9  ;;  %v77_v21 = vmin.f32 %v42_v1, %v49_v5  ;;  %v56_v22 = vsub.f32 %v54_v14, %v55_v10  ;;  %v60_v23 = vsub.f32 %v58_v15, %v59_v11  ;;  %p176_p5 = por %p175_p4, %p174_p3 }
  0x2c   :  { %v68_v24 = vmul.f32 %v67_v17, %v66_v16  ;;  %v84_v25 = vadd.f32 %v51_v8, %v47_v4  ;;  %v74_v26 = vsub.f32 %v72_v19, %v73_v13  ;;  %v87_v28 = vadd.f32 %v53_v9, %v49_v5 }
  0x2d   :  { %v78_v27 = vsub.f32 %v76_v20, %v77_v21  ;;  %v88_v29 = vadd.f32 %v46_v3, %v42_v1  ;;  %v57_v30 = vmax.f32 %v56_v22, 0.0  ;;  %v61_v31 = vmax.f32 %v60_v23, 0.0  ;;  %p177_p6 = pnand %p176_p5, %p170_p2 }
  0x2e   :  { %v69_v32 = vadd.f32 %v68_v24, %v65_v18  ;;  %v86_v33 = vsub.f32 %v84_v25, %v85_v7  ;;  %v75_v34 = vmax.f32 %v74_v26, 0.0 }
  0x2f   :  { %v79_v35 = vmax.f32 %v78_v27, 0.0  ;;  %v89_v36 = vsub.f32 %v87_v28, %v88_v29  ;;  %v62_v37 = vmul.f32 %v61_v31, %v57_v30 }
  0x30   :  { %v90_v38 = vmul.f32 %v86_v33, %v86_v33  ;;  %v80_v39 = vmul.f32 %v75_v34, %v75_v34 }
  0x31   :  { %v81_v40 = vmul.f32 %v79_v35, %v79_v35  ;;  %v91_v41 = vmul.f32 %v89_v36, %v89_v36  ;;  %v70_v42 = vsub.f32 %v69_v32, %v62_v37 }
  0x33   :  { %v82_v43 = vadd.f32 %v81_v40, %v80_v39  ;;  %v71_v44 = vadd.f32 1e-07, %v70_v42  ;;  %v92_v45 = vadd.f32 %v91_v41, %v90_v38 }
  0x35   :  { %v83_v46 = vadd.f32 1e-07, %v82_v43  ;;  %v93_v48 = vmul.f32 0.25, %v92_v45 }
  0x37   :  { %v97_v47 = vmul.f32 %v83_v46, %v71_v44  ;;  %v94_v49 = vmul.f32 %v83_v46, %v62_v37  ;;  %v95_v50 = vmul.f32 %v93_v48, %v71_v44 }
  0x39   :  { %123 = vrcp.f32 %v97_v47  ;;  %v96_v51 = vsub.f32 %v94_v49, %v95_v50 }
  0x43   :  { %v124_v52 = vpop.eup %123 }
  0x44   :  { %v99_v53 = vmul.f32 %v124_v52, %v96_v51 }
  0x46   :  { %v100_v54 = vsub.f32 1.0, %v99_v53 }
  0x48   :  { %101 = vst [vmem:[#allocation7] sm:$0xff] %v100_v54 }
  0x49   :  { %180 = shalt.err (!%p177_p6)
}
  0x4a   :  { %s181_s10 = scalar_lea.hbm %s255_s2, 128 }
  0x4b   :  { %p182_p7 = scmp.ne.s32.totalorder %s255_s2, %s181_s10  ;;  %p185_p8 = scmp.lt.u32.totalorder %s181_s10, %s255_s2 }
  0x4d   :  { %p187_p9 = pnand %p185_p8, %p182_p7 }
  0x4f   :  { %190 = shalt.err (!%p187_p9)
}
  0x50   :  { %111 = dma.vmem_to_hbm [thread:$0]  %s109_s6, 128, %s255_s2, [#allocation4]  }
  0x51   :  { %195 = dma.done.wait [#allocation4], 128  }
  0x52   :  { %196 = vsyncadd [#allocation4], 4294967168 }
  0x53   :  { %115 = vsyncpa [#allocation3], 1 }
  0x54   :  { %116 = vsyncpa [#allocation6], 1 }
  0x55   :  { %117 = vsyncpa [#allocation4], 1 }

</bundles_post_ra>
